<compile_context>
chip_gen: v7x
topology: tpu7x:2x2x1
jax: 0.10.0
libtpu: 0.0.40
codegen_flags: <defaults>
</compile_context>

<pallas_src>
import functools

import jax
import jax.numpy as jnp
from jax.experimental import pallas as pl
from jax.experimental.pallas import tpu as pltpu


def _round_up(n, m):
    return ((n + m - 1) // m) * m


def _fused_mlp_kernel(*refs, depth):
    """refs = (x_ref, w0, b0, ..., w_{depth-1}, b_{depth-1}, o_ref).

    x_ref:  (bt, d0_pad)                      current batch tile (f32)
    w_i:    (1, d_i_pad, d_{i+1}_pad)         current head's layer-i weights
    b_i:    (1, 1, d_{i+1}_pad)               current head's layer-i bias
    o_ref:  (1, bt, d_last_pad)               current (head, batch-tile) output block
    """
    x_ref = refs[0]
    o_ref = refs[-1]
    wb = refs[1:-1]

    h = x_ref[...]  # already f32; no redundant cast
    for i in range(depth):
        w = wb[2 * i][0]        # (d_i_pad, d_{i+1}_pad)
        b = wb[2 * i + 1][0]    # (1, d_{i+1}_pad) -> broadcasts over batch tile
        h = jnp.dot(h, w, preferred_element_type=jnp.float32) + b
        if i < depth - 1:       # ReLU after every layer except the last (matches module)
            h = jnp.maximum(h, 0.0)
    o_ref[0] = h.astype(o_ref.dtype)


def multi_output_regression_forward(x, params, *, batch_tile=512):
    """Fused forward for MultiOutputRegression.

    x:      (batch, layers[0]) float32
    params: list (one per output head) of (weights, biases); weights[i] is
            (layers[i], layers[i+1]) pre-transposed vs torch, biases[i] is (layers[i+1],).
    Returns: list of (batch, layers[-1]) arrays, one per head.
    """
    num_heads = len(params)
    depth = len(params[0][0])
    batch, in_dim = x.shape

    # Layer widths (shared across heads) and their lane-padded versions.
    dims = [in_dim] + [w.shape[1] for w in params[0][0]]
    dims_pad = [_round_up(d, 128) for d in dims]

    # Batch tiling: sublane-align, single tile if small, otherwise `batch_tile` rows.
    bt = min(_round_up(batch, 8), batch_tile)
    batch_pad = _round_up(batch, bt)
    num_bt = batch_pad // bt

    # Zero-pad the input slab (extra rows/cols contribute nothing -> exact results).
    x_pad = jnp.pad(x, ((0, batch_pad - batch), (0, dims_pad[0] - in_dim)))

    # Stack each layer's weights/biases across heads and zero-pad to lane-dense shapes.
    args = [x_pad]
    in_specs = [pl.BlockSpec((bt, dims_pad[0]), lambda bi, h: (bi, 0))]
    for i in range(depth):
        w_stack = jnp.stack([params[h][0][i] for h in range(num_heads)])  # (H, d_i, d_{i+1})
        w_stack = jnp.pad(
            w_stack,
            ((0, 0), (0, dims_pad[i] - dims[i]), (0, dims_pad[i + 1] - dims[i + 1])),
        )
        b_stack = jnp.stack([params[h][1][i] for h in range(num_heads)])  # (H, d_{i+1})
        b_stack = jnp.pad(b_stack, ((0, 0), (0, dims_pad[i + 1] - dims[i + 1])))
        b_stack = b_stack.reshape(num_heads, 1, dims_pad[i + 1])

        args.append(w_stack)
        args.append(b_stack)
        # Weights/biases depend only on the head index -> resident across batch tiles.
        in_specs.append(
            pl.BlockSpec((1, dims_pad[i], dims_pad[i + 1]), lambda bi, h: (h, 0, 0))
        )
        in_specs.append(
            pl.BlockSpec((1, 1, dims_pad[i + 1]), lambda bi, h: (h, 0, 0))
        )

    out_shape = jax.ShapeDtypeStruct((num_heads, batch_pad, dims_pad[-1]), x.dtype)
    out_spec = pl.BlockSpec((1, bt, dims_pad[-1]), lambda bi, h: (h, bi, 0))

    flops = 2 * batch_pad * num_heads * sum(
        dims_pad[i] * dims_pad[i + 1] for i in range(depth)
    )
    bytes_accessed = 4 * (
        x_pad.size
        + sum(a.size for a in args[1:])
        + num_heads * batch_pad * dims_pad[-1]
    )

    kernel = functools.partial(_fused_mlp_kernel, depth=depth)
    out = pl.pallas_call(
        kernel,
        out_shape=out_shape,
        grid=(num_bt, num_heads),
        in_specs=in_specs,
        out_specs=out_spec,
        compiler_params=pltpu.CompilerParams(
            dimension_semantics=("parallel", "parallel"),
        ),
        cost_estimate=pl.CostEstimate(
            flops=flops, transcendentals=0, bytes_accessed=bytes_accessed
        ),
    )(*args)

    # Slice padding off and return the per-head list (matches the torch module's output).
    return [out[h, :batch, : dims[-1]] for h in range(num_heads)]


def init_single_net(key, layers):
    """Deterministic torch.nn.Linear-style init (uniform +/- 1/sqrt(fan_in))."""
    weights, biases = [], []
    for i in range(len(layers) - 1):
        fan_in, fan_out = layers[i], layers[i + 1]
        key, kw, kb = jax.random.split(key, 3)
        bound = 1.0 / jnp.sqrt(jnp.asarray(fan_in, jnp.float32))
        # stored as (in, out): transpose of torch's (out, in) layout
        w = jax.random.uniform(kw, (fan_in, fan_out), jnp.float32, -bound, bound)
        b = jax.random.uniform(kb, (fan_out,), jnp.float32, -bound, bound)
        weights.append(w)
        biases.append(b)
    return key, weights, biases


def _reference_forward(x, params):
    outs = []
    for ws, bs in params:
        h = x
        for i, (w, b) in enumerate(zip(ws, bs)):
            h = h @ w + b
            if i < len(ws) - 1:
                h = jnp.maximum(h, 0.0)
        outs.append(h)
    return outs


if __name__ == "__main__":
    # layers = [in, hidden, hidden, out]; two output heads (num_outputs=2)
    layers = [16, 32, 32, 8]
    num_outputs = 2
    batch = 8

    key = jax.random.PRNGKey(0)
    key, kx = jax.random.split(key)
    x = jax.random.normal(kx, (batch, layers[0]), jnp.float32)

    params = []
    for _ in range(num_outputs):
        key, ws, bs = init_single_net(key, layers)
        params.append((ws, bs))

    outs = multi_output_regression_forward(x, params)
    outs = [jax.block_until_ready(o) for o in outs]

    # correctness check against plain-JAX reference of the torch forward
    refs = _reference_forward(x, params)
    for o, r in zip(outs, refs):
        assert o.shape == (batch, layers[-1])
        assert jnp.allclose(o, r, atol=1e-5, rtol=1e-5)

    print("KERNEL_OK")
</pallas_src>

<mosaic_0001>
module attributes {stable_mosaic.version = 11 : i64} {
  func.func @_fused_mlp_kernel(%arg0: i32, %arg1: i32, %arg2: memref<8x128xf32, #tpu.memory_space<vmem>>, %arg3: memref<1x128x128xf32, #tpu.memory_space<vmem>>, %arg4: memref<1x1x128xf32, #tpu.memory_space<vmem>>, %arg5: memref<1x128x128xf32, #tpu.memory_space<vmem>>, %arg6: memref<1x1x128xf32, #tpu.memory_space<vmem>>, %arg7: memref<1x128x128xf32, #tpu.memory_space<vmem>>, %arg8: memref<1x1x128xf32, #tpu.memory_space<vmem>>, %arg9: memref<1x8x128xf32, #tpu.memory_space<vmem>>) attributes {dimension_semantics = [#tpu.dimension_semantics<parallel>, #tpu.dimension_semantics<parallel>], iteration_bounds = array<i64: 1, 2>, scalar_prefetch = 0 : i64, scratch_operands = 0 : i64, tpu.core_type = #tpu.core_type<tc>, window_params = [{transform_indices = @transform_0, window_bounds = array<i64: 8, 128>}, {transform_indices = @transform_1, window_bounds = array<i64: 1, 128, 128>}, {transform_indices = @transform_2, window_bounds = array<i64: 1, 1, 128>}, {transform_indices = @transform_3, window_bounds = array<i64: 1, 128, 128>}, {transform_indices = @transform_4, window_bounds = array<i64: 1, 1, 128>}, {transform_indices = @transform_5, window_bounds = array<i64: 1, 128, 128>}, {transform_indices = @transform_6, window_bounds = array<i64: 1, 1, 128>}, {transform_indices = @transform_7, window_bounds = array<i64: 1, 8, 128>}]} {
    %c0 = arith.constant 0 : index
    %c0_0 = arith.constant 0 : index
    %0 = vector.load %arg2[%c0, %c0_0] : memref<8x128xf32, #tpu.memory_space<vmem>>, vector<8x128xf32>
    %c0_1 = arith.constant 0 : index
    %c0_2 = arith.constant 0 : index
    %c0_3 = arith.constant 0 : index
    %1 = vector.load %arg3[%c0_1, %c0_2, %c0_3] : memref<1x128x128xf32, #tpu.memory_space<vmem>>, vector<1x128x128xf32>
    %2 = vector.shape_cast %1 : vector<1x128x128xf32> to vector<128x128xf32>
    %c0_4 = arith.constant 0 : index
    %c0_5 = arith.constant 0 : index
    %c0_6 = arith.constant 0 : index
    %3 = vector.load %arg4[%c0_4, %c0_5, %c0_6] : memref<1x1x128xf32, #tpu.memory_space<vmem>>, vector<1x1x128xf32>
    %4 = vector.shape_cast %3 : vector<1x1x128xf32> to vector<1x128xf32>
    %cst = arith.constant dense<0.000000e+00> : vector<8x128xf32>
    %5 = tpu.matmul %0, %2, %cst {dimension_numbers = #tpu.dot_dimension_numbers<[1], [0], [0], [1], [0, 0, 1, 1], [], []>} : vector<8x128xf32>, vector<128x128xf32>, vector<8x128xf32> -> vector<8x128xf32>
    %6 = vector.broadcast %4 : vector<1x128xf32> to vector<8x128xf32>
    %7 = arith.addf %5, %6 : vector<8x128xf32>
    %cst_7 = arith.constant 0.000000e+00 : f32
    %8 = vector.broadcast %cst_7 : f32 to vector<8x128xf32>
    %9 = arith.maximumf %7, %8 : vector<8x128xf32>
    %c0_8 = arith.constant 0 : index
    %c0_9 = arith.constant 0 : index
    %c0_10 = arith.constant 0 : index
    %10 = vector.load %arg5[%c0_8, %c0_9, %c0_10] : memref<1x128x128xf32, #tpu.memory_space<vmem>>, vector<1x128x128xf32>
    %11 = vector.shape_cast %10 : vector<1x128x128xf32> to vector<128x128xf32>
    %c0_11 = arith.constant 0 : index
    %c0_12 = arith.constant 0 : index
    %c0_13 = arith.constant 0 : index
    %12 = vector.load %arg6[%c0_11, %c0_12, %c0_13] : memref<1x1x128xf32, #tpu.memory_space<vmem>>, vector<1x1x128xf32>
    %13 = vector.shape_cast %12 : vector<1x1x128xf32> to vector<1x128xf32>
    %cst_14 = arith.constant dense<0.000000e+00> : vector<8x128xf32>
    %14 = tpu.matmul %9, %11, %cst_14 {dimension_numbers = #tpu.dot_dimension_numbers<[1], [0], [0], [1], [0, 0, 1, 1], [], []>} : vector<8x128xf32>, vector<128x128xf32>, vector<8x128xf32> -> vector<8x128xf32>
    %15 = vector.broadcast %13 : vector<1x128xf32> to vector<8x128xf32>
    %16 = arith.addf %14, %15 : vector<8x128xf32>
    %cst_15 = arith.constant 0.000000e+00 : f32
    %17 = vector.broadcast %cst_15 : f32 to vector<8x128xf32>
    %18 = arith.maximumf %16, %17 : vector<8x128xf32>
    %c0_16 = arith.constant 0 : index
    %c0_17 = arith.constant 0 : index
    %c0_18 = arith.constant 0 : index
    %19 = vector.load %arg7[%c0_16, %c0_17, %c0_18] : memref<1x128x128xf32, #tpu.memory_space<vmem>>, vector<1x128x128xf32>
    %20 = vector.shape_cast %19 : vector<1x128x128xf32> to vector<128x128xf32>
    %c0_19 = arith.constant 0 : index
    %c0_20 = arith.constant 0 : index
    %c0_21 = arith.constant 0 : index
    %21 = vector.load %arg8[%c0_19, %c0_20, %c0_21] : memref<1x1x128xf32, #tpu.memory_space<vmem>>, vector<1x1x128xf32>
    %22 = vector.shape_cast %21 : vector<1x1x128xf32> to vector<1x128xf32>
    %cst_22 = arith.constant dense<0.000000e+00> : vector<8x128xf32>
    %23 = tpu.matmul %18, %20, %cst_22 {dimension_numbers = #tpu.dot_dimension_numbers<[1], [0], [0], [1], [0, 0, 1, 1], [], []>} : vector<8x128xf32>, vector<128x128xf32>, vector<8x128xf32> -> vector<8x128xf32>
    %24 = vector.broadcast %22 : vector<1x128xf32> to vector<8x128xf32>
    %25 = arith.addf %23, %24 : vector<8x128xf32>
    %c0_23 = arith.constant 0 : index
    %c0_24 = arith.constant 0 : index
    %c0_25 = arith.constant 0 : index
    %26 = vector.load %arg9[%c0_23, %c0_24, %c0_25] : memref<1x8x128xf32, #tpu.memory_space<vmem>>, vector<1x8x128xf32>
    %27 = vector.shape_cast %26 : vector<1x8x128xf32> to vector<8x128xf32>
    %28 = vector.shape_cast %25 : vector<8x128xf32> to vector<1x8x128xf32>
    tpu.vector_store %arg9[%c0_23, %c0_24, %c0_25], %28 {strides = array<i32>} : memref<1x8x128xf32, #tpu.memory_space<vmem>>, vector<1x8x128xf32>,
    return
  }
  func.func @transform_0(%arg0: i32, %arg1: i32) -> (i32, i32) {
    %c0_i32 = arith.constant 0 : i32
    %c0_i32_0 = arith.constant 0 : i32
    return %arg0, %c0_i32 : i32, i32
  }
  func.func @transform_1(%arg0: i32, %arg1: i32) -> (i32, i32, i32) {
    %c0_i32 = arith.constant 0 : i32
    %c0_i32_0 = arith.constant 0 : i32
    %c0_i32_1 = arith.constant 0 : i32
    return %arg1, %c0_i32, %c0_i32_0 : i32, i32, i32
  }
  func.func @transform_2(%arg0: i32, %arg1: i32) -> (i32, i32, i32) {
    %c0_i32 = arith.constant 0 : i32
    %c0_i32_0 = arith.constant 0 : i32
    %c0_i32_1 = arith.constant 0 : i32
    return %arg1, %c0_i32, %c0_i32_0 : i32, i32, i32
  }
  func.func @transform_3(%arg0: i32, %arg1: i32) -> (i32, i32, i32) {
    %c0_i32 = arith.constant 0 : i32
    %c0_i32_0 = arith.constant 0 : i32
    %c0_i32_1 = arith.constant 0 : i32
    return %arg1, %c0_i32, %c0_i32_0 : i32, i32, i32
  }
  func.func @transform_4(%arg0: i32, %arg1: i32) -> (i32, i32, i32) {
    %c0_i32 = arith.constant 0 : i32
    %c0_i32_0 = arith.constant 0 : i32
    %c0_i32_1 = arith.constant 0 : i32
    return %arg1, %c0_i32, %c0_i32_0 : i32, i32, i32
  }
  func.func @transform_5(%arg0: i32, %arg1: i32) -> (i32, i32, i32) {
    %c0_i32 = arith.constant 0 : i32
    %c0_i32_0 = arith.constant 0 : i32
    %c0_i32_1 = arith.constant 0 : i32
    return %arg1, %c0_i32, %c0_i32_0 : i32, i32, i32
  }
  func.func @transform_6(%arg0: i32, %arg1: i32) -> (i32, i32, i32) {
    %c0_i32 = arith.constant 0 : i32
    %c0_i32_0 = arith.constant 0 : i32
    %c0_i32_1 = arith.constant 0 : i32
    return %arg1, %c0_i32, %c0_i32_0 : i32, i32, i32
  }
  func.func @transform_7(%arg0: i32, %arg1: i32) -> (i32, i32, i32) {
    %c0_i32 = arith.constant 0 : i32
    %c0_i32_0 = arith.constant 0 : i32
    return %arg1, %arg0, %c0_i32 : i32, i32, i32
  }
}

</mosaic_0001>

<bundles_post_ra>
// kernel: tpu_custom_call.1
= control target key start
LH: loop header
LB: loop body
LE: loop exit
PB: predicated region body
PF: predicated region fallthrough
CT: control target
= control target key end

     0   :  { %s1922_s0 = inlined_call_operand.hbm [shape: f32[8,128], index: 0, kind: input, shape index: {}]   ;;  %s1923_s1 = inlined_call_operand.hbm [shape: f32[2,128,128], index: 1, kind: input, shape index: {}]   ;;  %s1924_s2 = inlined_call_operand.vmem [shape: f32[2,1,128], index: 2, kind: input, shape index: {}]   ;;  %s1925_s3 = inlined_call_operand.hbm [shape: f32[2,128,128], index: 3, kind: input, shape index: {}]   ;;  %s1926_s4 = inlined_call_operand.vmem [shape: f32[2,1,128], index: 4, kind: input, shape index: {}]   ;;  %s1927_s5 = inlined_call_operand.hbm [shape: f32[2,128,128], index: 5, kind: input, shape index: {}]   ;;  %s1928_s6 = inlined_call_operand.vmem [shape: f32[2,1,128], index: 6, kind: input, shape index: {}]   ;;  %s1929_s7 = inlined_call_operand.hbm [shape: f32[2,8,128], index: 7, kind: output, shape index: {}]  }
   0x1   :  { %1950 = sst [smem:[#allocation21_spill]] %s1923_s1 }
   0x2   :  { %1951 = sst [smem:[#allocation22_spill]] %s1925_s3 }
   0x3   :  { %12 = vsyncpa [#allocation3], 0 }
   0x4   :  { %13 = vsyncpa [#allocation6], 0 }
   0x5   :  { %15 = vsyncpa [#allocation6 + $0x1], 0 }
   0x6   :  { %16 = vsyncpa [#allocation9], 0 }
   0x7   :  { %18 = vsyncpa [#allocation9 + $0x1], 0 }
   0x8   :  { %19 = vsyncpa [#allocation4], 0 }
   0x9   :  { %21 = vsyncpa [#allocation4 + $0x1], 0  ;;  %s1517_s24 = smov 0   ;;  %s1519_s25 = smov 0  }
   0xa   :  { %s1521_s26 = smov 0   ;;  %s1523_s27 = smov 0  }
   0xb   :  { %s1525_s28 = smov 0   ;;  %s1527_s29 = smov 0  }
   0xc LB: > { %1952 = sst [smem:[#allocation15_spill]] %s1445_s24  ;;  %s36_s30 = sadd.s32 1, %s1461_s28  ;;  %s1465_s29 = sphi %s1527_s29, %s27_s29   ;;  %s1461_s28 = sphi %s1525_s28, %s1986_s28   ;;  %s1457_s27 = sphi %s1523_s27, %s1985_s27   ;;  %s1453_s26 = sphi %s1521_s26, %s1989_s26   ;;  %s1449_s25 = sphi %s1519_s25, %s1988_s25   ;;  %s1445_s24 = sphi %s1517_s24, %s1987_s24  }
   0xd   : > { %1953 = sst [smem:[#allocation16_spill]] %s1461_s28  ;;  %s72_s8 = sadd.s32 1, %s1453_s26 }
   0xe   : > { %1954 = sst [smem:[#allocation17_spill]] %s1465_s29  ;;  %p37_p0 = scmp.ge.s32.totalorder %s36_s30, 2 }
   0xf   : > { %p1930_p1 = scmp.ne.s32.totalorder %s1453_s26, %s1449_s25  ;;  %p80_p2 = scmp.eq.s32.totalorder %s1465_s29, 0 }
  0x10   : > { %s1991_s30 = smov (%p37_p0, %s36_s30), 0  ;;  %p1200_p5 = scmp.lt.s32.totalorder %s1465_s29, 2 }
  0x11   : > { %1955 = sst [smem:[#allocation18_spill]] %s1991_s30  ;;  %p81_p4 = por %p80_p2, %p1930_p1 }
  0x12   : > { %s69_s9 = ssub.s32 %s1461_s28, %s1991_s30  ;;  %s280_s10 = sand.u32 1, %s1465_s29  }
  0x13   : > { %p70_p6 = scmp.eq.s32.totalorder %s69_s9, 0  ;;  %s1931_s11 = sand.u32 1, %s1453_s26  }
  0x14   : > { %s1564_s12 = sshll.u32 %s1461_s28, 11  ;;  %s1571_s14 = sshll.u32 %s1931_s11, 7 }
  0x15   : > { %s1567_s13 = scalar_select %p70_p6, %s1453_s26, %s72_s8  }
  0x16   : > { %s1957_s1 = sld [smem:[#allocation21_spill]]  ;;  %p1579_p7 = pnand %p1200_p5, %p81_p4 }
  0x17   : > { %1956 = sst [smem:[#allocation19_spill]] %s1567_s13  ;;  %s284_s19 = scalar_lea.vmem [#allocation5], %s1571_s14 }
  0x18   : > { %s1958_s18 = scalar_select %p1579_p7, 1, 0 }
  0x19   : > { %s291_s20 = sshll.u32 %s284_s19, 4  ;;  %s1586_s21 = scalar_lea.sflag [#allocation6], %s280_s10  ;;  %s1584_s20 = int_to_ptr.vmem [resolvable:$true] %s291_s20 }
  0x1a   : > { %p1592_p9 = pneg %p1579_p7 }
  0x1c   : > { %s1577_s17 = scalar_lea.hbm %s1957_s1, %s1564_s12  ;;  %s1262_s15 = scalar_lea.hbm %s1957_s1, 4096 }
  0x1d   : > { %s1257_s22 = scalar_lea.hbm %s1577_s17, 2048  ;;  %p1263_p12 = scmp.lt.u32.totalorder %s1577_s17, %s1957_s1 }
  0x1e   : > { %p1258_p8 = scmp.ne.s32.totalorder %s1577_s17, %s1257_s22  ;;  %p1264_p13 = scmp.lt.u32.totalorder %s1262_s15, %s1257_s22 }
  0x1f   : > { %s1959_s23 = scalar_select %p1592_p9, 1, 0 }
  0x20   : > { %p1260_p10 = pnand %p1592_p9, %p1258_p8  ;;  %p1265_p0 = por %p1264_p13, %p1263_p12 }
  0x21   : > { %p1266_p2 = scmp.lt.u32.totalorder %s1257_s22, %s1577_s17 }
  0x22   : > { %p1261_p11 = pneg %p1260_p10 }
  0x23   : > { %p1267_p4 = por %p1266_p2, %p1265_p0 }
  0x25   : > { %p1268_p5 = pnand %p1267_p4, %p1261_p11 }
  0x27   : > { %1271 = shalt.err (!%p1268_p5)
}
  0x28   : > { %s1272_s10 = scalar_lea.vmem %s1584_s20, 2048  ;;  %s1467_s8 = smov [#allocation5]  }
  0x29   : > { %p1273_p6 = scmp.ne.s32.totalorder %s1584_s20, %s1272_s10  ;;  %s1277_s9 = sshll.u32 %s1467_s8, 4  ;;  %s1278_s9 = int_to_ptr.vmem [resolvable:$false] %s1277_s9 }
  0x2a   : > { %s1279_s16 = scalar_lea.vmem %s1278_s9, 4096  ;;  %p1280_p3 = scmp.lt.s32.totalorder %s1584_s20, %s1278_s9 }
  0x2b   : > { %p1275_p8 = pnand %p1273_p6, %p1592_p9  ;;  %p1281_p1 = scmp.lt.s32.totalorder %s1279_s16, %s1272_s10 }
  0x2d   : > { %p1276_p10 = pneg %p1275_p8  ;;  %p1282_p12 = por %p1281_p1, %p1280_p3 }
  0x2f   : > { %p1283_p13 = pnand %p1282_p12, %p1276_p10 }
  0x31   : > { %1286 = shalt.err (!%p1283_p13)
}
  0x32   : > { %s1932_s22 = smov 128   ;;  %s1934_s15 = smov 8  }
  0x33   : > { %1188 = dma.hbm_to_vmem [thread:$0]  (!%p1579_p7), %s1577_s17, 2048, %s1584_s20, %s1586_s21, %s1932_s22, %s1932_s22, %s1934_s15  }
  0x34   : > { %s1620_s19 = sadd.s32 4294967295, %s1465_s29   ;;  %s912_s10 = sadd.s32 4294967294, %s1465_s29  }
  0x35   : > { %p85_p1 = scmp.ne.s32.totalorder %s1449_s25, %s1445_s24  ;;  %p1941_p3 = scmp.eq.s32.totalorder %s1620_s19, 0 }
  0x36   : > { %p241_p11 = scmp.eq.s32.totalorder %s1620_s19, 1  ;;  %p247_p0 = scmp.eq.s32.totalorder %s912_s10, 1 }
  0x37   : > { %p913_p2 = scmp.ge.s32.totalorder %s1465_s29, 1  ;;  %p1630_p4 = por %p1941_p3, %p85_p1 }
  0x38   : > { %p1961_p5 = scmp.ne.s32.totalorder %s1453_s26, %s1449_s25  ;;  %p1641_p8 = por %p247_p0, %p85_p1 }
  0x39   : > { %s1960_s8 = scalar_select %p1630_p4, 1, 0 }
  0x3a   : > { %p1637_p6 = por %p241_p11, %p1961_p5  ;;  %p254_p10 = scmp.lt.s32.totalorder %s1465_s29, 3 }
  0x3b   : > { %s1963_s20 = scalar_select %p1641_p8, 1, 0 }
  0x3c   : > { %s1962_s17 = scalar_select %p1637_p6, 1, 0 }
  0x3d   : > { %1964 = sst [smem:[#allocation20_spill]] %s1963_s20  ;;  %p1646_p12 = pnand %p913_p2, %p254_p10 }
  0x3e   : > { %s1470_s16 = smov [#allocation2]   ;;  %s1966_s3 = sld [smem:[#allocation22_spill]] }
  0x3f   : > { %s1965_s9 = scalar_select %p1646_p12, 1, 0 }
  0x40   : > { %s269_s10 = sshll.u32 %s1470_s16, 4  ;;  %p1181_p13 = pneg %p1646_p12  ;;  %s1650_s10 = int_to_ptr.vmem [resolvable:$true] %s269_s10 }
  0x41   : > { %s311_s1 = scalar_lea.vmem [#allocation7], %s1571_s14 }
  0x42   : > { %s318_s30 = sshll.u32 %s311_s1, 4  ;;  %p1663_p1 = pnand %p1181_p13, %p1941_p3  ;;  %s1667_s30 = int_to_ptr.vmem [resolvable:$true] %s318_s30 }
  0x44   : > { %s1658_s15 = scalar_lea.hbm %s1966_s3, %s1564_s12  ;;  %s1292_s13 = scalar_lea.hbm %s1966_s3, 4096 }
  0x45   : > { %s1967_s28 = scalar_select %p1663_p1, 1, 0 }
  0x46   : > { %s1287_s16 = scalar_lea.hbm %s1658_s15, 2048  ;;  %p1293_p5 = scmp.lt.u32.totalorder %s1658_s15, %s1966_s3 }
  0x47   : > { %p1288_p11 = scmp.ne.s32.totalorder %s1658_s15, %s1287_s16  ;;  %p1294_p10 = scmp.lt.u32.totalorder %s1292_s13, %s1287_s16 }
  0x48   : > { %p1296_p3 = scmp.lt.u32.totalorder %s1287_s16, %s1658_s15 }
  0x49   : > { %p1290_p0 = pnand %p1288_p11, %p1592_p9  ;;  %p1295_p13 = por %p1294_p10, %p1293_p5 }
  0x4b   : > { %p1291_p2 = pneg %p1290_p0  ;;  %p1297_p8 = por %p1296_p3, %p1295_p13 }
  0x4d   : > { %p1298_p6 = pnand %p1297_p8, %p1291_p2 }
  0x4f   : > { %1301 = shalt.err (!%p1298_p6)
}
  0x50   : > { %s1302_s1 = scalar_lea.vmem %s1667_s30, 2048  ;;  %s1471_s11 = smov [#allocation7]  }
  0x51   : > { %p1303_p11 = scmp.ne.s32.totalorder %s1667_s30, %s1302_s1  ;;  %s1307_s22 = sshll.u32 %s1471_s11, 4  ;;  %s1308_s22 = int_to_ptr.vmem [resolvable:$false] %s1307_s22 }
  0x52   : > { %s1309_s29 = scalar_lea.vmem %s1308_s22, 4096  ;;  %p1310_p12 = scmp.lt.s32.totalorder %s1667_s30, %s1308_s22 }
  0x53   : > { %p1305_p0 = pnand %p1303_p11, %p1592_p9  ;;  %p1311_p1 = scmp.lt.s32.totalorder %s1309_s29, %s1302_s1 }
  0x55   : > { %p1306_p4 = pneg %p1305_p0  ;;  %p1312_p5 = por %p1311_p1, %p1310_p12 }
  0x57   : > { %p1313_p10 = pnand %p1312_p5, %p1306_p4 }
  0x59   : > { %1316 = shalt.err (!%p1313_p10)
}
  0x5a   : > { %s1968_s13 = smov 8   ;;  %s1969_s20 = smov 128  }
  0x5b   : > { %1191 = dma.hbm_to_vmem [thread:$0]  (!%p1579_p7), %s1658_s15, 2048, %s1667_s30, %s1586_s21, %s1969_s20, %s1969_s20, %s1968_s13  }
  0x5c   : > { %s1317_s11 = scalar_lea.hbm %s1922_s0, 128  ;;  %p1970_p4 = scmp.ne.s32.totalorder %s1967_s28, 0 }
  0x5d   : > { %p1318_p3 = scmp.ne.s32.totalorder %s1922_s0, %s1317_s11  ;;  %p1324_p1 = scmp.lt.u32.totalorder %s1317_s11, %s1922_s0 }
  0x5e   : > { %p1319_p6 = pneg %p1970_p4 }
  0x60   : > { %p1320_p8 = pnand %p1319_p6, %p1318_p3 }
  0x62   : > { %p1321_p12 = pneg %p1320_p8 }
  0x64   : > { %p1326_p2 = pnand %p1324_p1, %p1321_p12 }
  0x66   : > { %1329 = shalt.err (!%p1326_p2)
}
  0x67   : > { %s1330_s30 = scalar_lea.vmem %s1650_s10, 128  ;;  %p1338_p5 = scmp.lt.s32.totalorder %s1650_s10, %s1650_s10 }
  0x68   : > { %p1331_p13 = scmp.ne.s32.totalorder %s1650_s10, %s1330_s30  ;;  %p1339_p10 = scmp.lt.s32.totalorder %s1330_s30, %s1330_s30 }
  0x6a   : > { %p1333_p11 = pnand %p1331_p13, %p1319_p6  ;;  %p1340_p7 = por %p1339_p10, %p1338_p5 }
  0x6c   : > { %p1334_p0 = pneg %p1333_p11 }
  0x6e   : > { %p1341_p9 = pnand %p1340_p7, %p1334_p0 }
  0x70   : > { %1344 = shalt.err (!%p1341_p9)
}
  0x71   : > { %1184 = dma.hbm_to_vmem [thread:$0]  (!%p1970_p4), %s1922_s0, 128, %s1650_s10, [#allocation3]  }
  0x72   : > { %s1719_s16 = scalar_lea.hbm %s1927_s5, %s1564_s12  ;;  %s338_s11 = scalar_lea.vmem [#allocation8], %s1571_s14 }
  0x73   : > { %s345_s28 = sshll.u32 %s338_s11, 4  ;;  %s1971_s22 = sand.u32 1, %s1453_s26   ;;  %s1722_s28 = int_to_ptr.vmem [resolvable:$true] %s345_s28 }
  0x74   : > { %s1726_s1 = scalar_lea.sflag [#allocation9], %s1971_s22  ;;  %s1345_s29 = scalar_lea.hbm %s1719_s16, 2048 }
  0x75   : > { %p1346_p7 = scmp.ne.s32.totalorder %s1719_s16, %s1345_s29  ;;  %p1972_p9 = scmp.ne.s32.totalorder %s1959_s23, 0 }
  0x76   : > { %s1350_s12 = scalar_lea.hbm %s1927_s5, 4096  ;;  %p1351_p6 = scmp.lt.u32.totalorder %s1719_s16, %s1927_s5 }
  0x77   : > { %p1348_p3 = pnand %p1346_p7, %p1972_p9  ;;  %p1352_p8 = scmp.lt.u32.totalorder %s1350_s12, %s1345_s29 }
  0x78   : > { %p1354_p1 = scmp.lt.u32.totalorder %s1345_s29, %s1719_s16 }
  0x79   : > { %p1349_p4 = pneg %p1348_p3  ;;  %p1353_p12 = por %p1352_p8, %p1351_p6 }
  0x7b   : > { %p1355_p2 = por %p1354_p1, %p1353_p12 }
  0x7d   : > { %p1356_p13 = pnand %p1355_p2, %p1349_p4 }
  0x7f   : > { %1359 = shalt.err (!%p1356_p13)
}
  0x80   : > { %s1360_s14 = scalar_lea.vmem %s1722_s28, 2048  ;;  %s1472_s21 = smov [#allocation8]  }
  0x81   : > { %p1361_p11 = scmp.ne.s32.totalorder %s1722_s28, %s1360_s14  ;;  %s1365_s15 = sshll.u32 %s1472_s21, 4  ;;  %s1366_s15 = int_to_ptr.vmem [resolvable:$false] %s1365_s15 }
  0x82   : > { %s1367_s11 = scalar_lea.vmem %s1366_s15, 4096  ;;  %p1368_p10 = scmp.lt.s32.totalorder %s1722_s28, %s1366_s15 }
  0x83   : > { %p1363_p0 = pnand %p1361_p11, %p1972_p9  ;;  %p1369_p7 = scmp.lt.s32.totalorder %s1367_s11, %s1360_s14 }
  0x85   : > { %p1364_p5 = pneg %p1363_p0  ;;  %p1370_p3 = por %p1369_p7, %p1368_p10 }
  0x87   : > { %p1371_p6 = pnand %p1370_p3, %p1364_p5 }
  0x89   : > { %1374 = shalt.err (!%p1371_p6)
}
  0x8a   : > { %p1973_p4 = scmp.ne.s32.totalorder %s1958_s18, 0  ;;  %p1974_p9 = scmp.ne.s32.totalorder %s1965_s9, 0 }
  0x8b   : > { %p1975_p8 = scmp.eq.s32.totalorder (!%p1974_p9), %s1620_s19, 0 }
  0x8c   : > { %1194 = dma.hbm_to_vmem [thread:$0]  (!%p1973_p4), %s1719_s16, 2048, %s1722_s28, %s1726_s1, %s1969_s20, %s1969_s20, %s1968_s13  }
  0x8d   : > { %363 = sbr.rel (%p1974_p9) target bundleno = 851 (0x353), region = 48 }
  0x94   : > { %1428 = dma.done.wait (%p1975_p8), [#allocation3], 128   ;;  %p1976_p12 = pmov %p1975_p8 }
  0x95   : > { %s369_s18 = sand.u32 1, %s1620_s19   ;;  %s1761_s23 = sand.u32 1, %s1449_s25  }
  0x96   : > { %1430 = vsyncadd (%p1976_p12), [#allocation3], 4294967168  ;;  %s927_s22 = sshll.u32 %s1761_s23, 7  ;;  %s370_s29 = scalar_lea.sflag [#allocation6], %s369_s18 }
  0x97   : > { %s1764_s10 = scalar_lea.vmem [#allocation5], %s927_s22  ;;  %p1977_p1 = scmp.ne.s32.totalorder %s1960_s8, 0 }
  0x99   : > { %1432 = dma.done.wait (%p1977_p1), %s370_s29, 4096  }
  0x9a   : > { %1434 = vsyncadd (%p1977_p1), %s370_s29, 4294963200  ;;  %s1770_s9 = scalar_lea.vmem [#allocation7], %s927_s22  ;;  %s388_s13 = scalar_lea.sflag [#allocation9], %s1761_s23 }
  0x9b   : > { %s1773_s20 = scalar_lea.vmem [#allocation8], %s927_s22 }
  0x9c   : > { %1436 = dma.done.wait (%p1977_p1), %s388_s13, 2048  }
  0x9d   : > { %1438 = vsyncadd (%p1977_p1), %s388_s13, 4294965248  ;;  %v1473_v0 = vmov 0.0|0.0   ;;  %vm1474_vm0 = vmmov 0   ;;  %v1475_v1 = vmov 0.0   ;;  %v451_v2 = vld [vmem:[%s1764_s10] sm:$0xff]  ;;  %v452_v3 = vld [vmem:[%s1764_s10 + $0x8] sm:$0xff] }
  0x9e   : > { %1097 = vmatprep.subr.bf16.mxu0 %v1473_v0  ;;  %1024 = vmatprep.mubr.msk.f32.mxu0 %vm1474_vm0, %v1475_v1  ;;  %v453_v4 = vld [vmem:[%s1764_s10 + $0x10] sm:$0xff]  ;;  %v1098_v5 = vpack.c.bf16 %v452_v3, %v451_v2  ;;  %v454_v6 = vld [vmem:[%s1764_s10 + $0x18] sm:$0xff]  ;;  %v455_v8 = vld [vmem:[%s1764_s10 + $0x20] sm:$0xff]  ;;  %p441_p2 = scmp.lt.s32.totalorder %s1457_s27, 1  ;;  %s930_s3 = sshll.u32 %s1761_s23, 3 }
  0x9f   : > { %1121 = vmatprep.subr.bf16.mxu1 %v1473_v0  ;;  %1059 = vmatprep.mubr.msk.f32.mxu1 %vm1474_vm0, %v1475_v1  ;;  %v1101_v7 = vpack.c.bf16 %v454_v6, %v453_v4  ;;  %v456_v9 = vld [vmem:[%s1764_s10 + $0x28] sm:$0xff]  ;;  %v545_v10 = vld [vmem:[%s1770_s9] sm:$0xff]  ;;  %v547_v12 = vld [vmem:[%s1770_s9 + $0x10] sm:$0xff]  ;;  %s935_s15 = sshll.u32 %s1457_s27, 7  ;;  %s440_s11 = scalar_lea.vmem [#allocation10], %s930_s3 }
  0xa0   : > { %1099 = vmatpush3.bf16.msra.mxu0 %v1098_v5  ;;  %v546_v11 = vld [vmem:[%s1770_s9 + $0x8] sm:$0xff]  ;;  %v548_v13 = vld [vmem:[%s1770_s9 + $0x18] sm:$0xff]  ;;  %v1104_v14 = vpack.c.bf16 %v456_v9, %v455_v8  ;;  %v457_v16 = vld [vmem:[%s1764_s10 + $0x30] sm:$0xff]  ;;  %s442_s19 = scalar_select %p441_p2, %s1457_s27, 1 }
  0xa1   : > { %1100 = vmatprep.subr.bf16.mxu0 %v1473_v0  ;;  %v1122_v15 = vpack.c.bf16 %v546_v11, %v545_v10  ;;  %v458_v17 = vld [vmem:[%s1764_s10 + $0x38] sm:$0xff]  ;;  %v1125_v18 = vpack.c.bf16 %v548_v13, %v547_v12  ;;  %v549_v19 = vld [vmem:[%s1770_s9 + $0x20] sm:$0xff]  ;;  %v550_v20 = vld [vmem:[%s1770_s9 + $0x28] sm:$0xff]  ;;  %s748_s18 = sshll.u32 %s440_s11, 4  ;;  %p1978_p11 = scmp.ne.s32.totalorder %s1962_s17, 0  ;;  %s1875_s18 = int_to_ptr.vmem [resolvable:$true] %s748_s18 }
  0xa2   : > { %v1107_v21 = vpack.c.bf16 %v458_v17, %v457_v16  ;;  %v459_v22 = vld [vmem:[%s1764_s10 + $0x40] sm:$0xff]  ;;  %v460_v23 = vld [vmem:[%s1764_s10 + $0x48] sm:$0xff]  ;;  %v1128_v24 = vpack.c.bf16 %v550_v20, %v549_v19  ;;  %v551_v25 = vld [vmem:[%s1770_s9 + $0x30] sm:$0xff]  ;;  %s443_s28 = scalar_lea.vmem %s1924_s2, %s442_s19  ;;  %s446_s12 = scalar_lea.vmem %s1926_s4, %s442_s19 }
  0xa3   : > { %1123 = vmatpush3.bf16.msra.mxu1 %v1122_v15  ;;  %v552_v26 = vld [vmem:[%s1770_s9 + $0x38] sm:$0xff]  ;;  %v1110_v27 = vpack.c.bf16 %v460_v23, %v459_v22  ;;  %v461_v28 = vld [vmem:[%s1764_s10 + $0x50] sm:$0xff]  ;;  %v553_v31 = vld [vmem:[%s1770_s9 + $0x40] sm:$0xff]  ;;  %s449_s21 = scalar_lea.vmem %s1928_s6, %s442_s19  ;;  %s1375_s13 = scalar_lea.vmem %s1875_s18, 128 }
  0xa4   : > { %1102 = vmatpush3.bf16.msra.mxu0 %v1101_v7  ;;  %1124 = vmatprep.subr.bf16.mxu1 %v1473_v0  ;;  %v462_v29 = vld [vmem:[%s1764_s10 + $0x58] sm:$0xff]  ;;  %v1131_v30 = vpack.c.bf16 %v552_v26, %v551_v25  ;;  %v554_v32 = vld [vmem:[%s1770_s9 + $0x48] sm:$0xff]  ;;  %v463_v34 = vld [vmem:[%s1764_s10 + $0x60] sm:$0xff]  ;;  %p1376_p13 = scmp.ne.s32.totalorder %s1875_s18, %s1375_s13  ;;  %s1476_s27 = smov [#allocation10]  }
  0xa5   : > { %1103 = vmatprep.subr.bf16.mxu0 %v1473_v0  ;;  %v1113_v33 = vpack.c.bf16 %v462_v29, %v461_v28  ;;  %v464_v35 = vld [vmem:[%s1764_s10 + $0x68] sm:$0xff]  ;;  %v1134_v36 = vpack.c.bf16 %v554_v32, %v553_v31  ;;  %v555_v37 = vld [vmem:[%s1770_s9 + $0x50] sm:$0xff]  ;;  %v556_v38 = vld [vmem:[%s1770_s9 + $0x58] sm:$0xff] }
  0xa6   : > { %v1116_v39 = vpack.c.bf16 %v464_v35, %v463_v34  ;;  %v465_v40 = vld [vmem:[%s1764_s10 + $0x70] sm:$0xff]  ;;  %v466_v41 = vld [vmem:[%s1764_s10 + $0x78] sm:$0xff]  ;;  %v1137_v42 = vpack.c.bf16 %v556_v38, %v555_v37  ;;  %v557_v43 = vld [vmem:[%s1770_s9 + $0x60] sm:$0xff]  ;;  %s1873_s10 = scalar_lea.hbm %s1929_s7, %s935_s15  ;;  %p1377_p0 = pnand %p1376_p13, %p1978_p11 }
  0xa7   : > { %1126 = vmatpush3.bf16.msra.mxu1 %v1125_v18  ;;  %v558_v44 = vld [vmem:[%s1770_s9 + $0x68] sm:$0xff]  ;;  %v1119_v45 = vpack.c.bf16 %v466_v41, %v465_v40  ;;  %v450_v47 = vld [vmem:[#allocation2] sm:$0xff]  ;;  %v559_v48 = vld [vmem:[%s1770_s9 + $0x70] sm:$0xff] }
  0xa8   : > { %1105 = vmatpush3.bf16.msra.mxu0 %v1104_v14  ;;  %1127 = vmatprep.subr.bf16.mxu1 %v1473_v0  ;;  %v1140_v46 = vpack.c.bf16 %v558_v44, %v557_v43  ;;  %v560_v49 = vld [vmem:[%s1770_s9 + $0x78] sm:$0xff]  ;;  %v639_v51 = vld [vmem:[%s1773_s20] sm:$0xff]  ;;  %v640_v52 = vld [vmem:[%s1773_s20 + $0x8] sm:$0xff]  ;;  %s734_s9 = scalar_lea.sflag [#allocation4], %s1761_s23  ;;  %p1378_p5 = pneg %p1377_p0 }
  0xa9   : > { %1106 = vmatprep.subr.bf16.mxu0 %v1473_v0  ;;  %v1143_v50 = vpack.c.bf16 %v560_v49, %v559_v48  ;;  %v641_v53 = vld [vmem:[%s1773_s20 + $0x10] sm:$0xff]  ;;  %v1146_v54 = vpack.c.bf16 %v640_v52, %v639_v51  ;;  %v642_v55 = vld [vmem:[%s1773_s20 + $0x18] sm:$0xff]  ;;  %v643_v57 = vld [vmem:[%s1773_s20 + $0x20] sm:$0xff] }
  0xaa   : > { %v1149_v56 = vpack.c.bf16 %v642_v55, %v641_v53  ;;  %v644_v58 = vld [vmem:[%s1773_s20 + $0x28] sm:$0xff]  ;;  %v645_v60 = vld [vmem:[%s1773_s20 + $0x30] sm:$0xff]  ;;  %v646_v61 = vld [vmem:[%s1773_s20 + $0x38] sm:$0xff] }
  0xab   : > { %1129 = vmatpush3.bf16.msra.mxu1 %v1128_v24  ;;  %v1152_v59 = vpack.c.bf16 %v644_v58, %v643_v57  ;;  %v1155_v62 = vpack.c.bf16 %v646_v61, %v645_v60  ;;  %v647_v63 = vld [vmem:[%s1773_s20 + $0x40] sm:$0xff]  ;;  %v649_v3 = vld [vmem:[%s1773_s20 + $0x50] sm:$0xff]  ;;  %v650_v4 = vld [vmem:[%s1773_s20 + $0x58] sm:$0xff] }
  0xac   : > { %1108 = vmatpush3.bf16.msra.mxu0 %v1107_v21  ;;  %1130 = vmatprep.subr.bf16.mxu1 %v1473_v0  ;;  %v1161_v5 = vpack.c.bf16 %v650_v4, %v649_v3  ;;  %v651_v6 = vld [vmem:[%s1773_s20 + $0x60] sm:$0xff]  ;;  %v652_v7 = vld [vmem:[%s1773_s20 + $0x68] sm:$0xff]  ;;  %v931_v9 = vld [vmem:[%s443_s28] ss:$0 sm:$0xff] }
  0xad   : > { %1109 = vmatprep.subr.bf16.mxu0 %v1473_v0  ;;  %v1164_v8 = vpack.c.bf16 %v652_v7, %v651_v6  ;;  %v653_v14 = vld [vmem:[%s1773_s20 + $0x70] sm:$0xff]  ;;  %v654_v15 = vld [vmem:[%s1773_s20 + $0x78] sm:$0xff] }
  0xae   : > { %v1167_v16 = vpack.c.bf16 %v654_v15, %v653_v14  ;;  %v933_v21 = vld [vmem:[%s449_s21] ss:$0 sm:$0xff] }
  0xaf   : > { %1132 = vmatpush3.bf16.msra.mxu1 %v1131_v30 }
  0xb0   : > { %1111 = vmatpush3.bf16.msra.mxu0 %v1110_v27  ;;  %1133 = vmatprep.subr.bf16.mxu1 %v1473_v0 }
  0xb1   : > { %1112 = vmatprep.subr.bf16.mxu0 %v1473_v0 }
  0xb3   : > { %1135 = vmatpush3.bf16.msra.mxu1 %v1134_v36 }
  0xb4   : > { %1114 = vmatpush3.bf16.msra.mxu0 %v1113_v33  ;;  %1136 = vmatprep.subr.bf16.mxu1 %v1473_v0 }
  0xb5   : > { %1115 = vmatprep.subr.bf16.mxu0 %v1473_v0 }
  0xb7   : > { %1138 = vmatpush3.bf16.msra.mxu1 %v1137_v42 }
  0xb8   : > { %1117 = vmatpush3.bf16.msra.mxu0 %v1116_v39  ;;  %1139 = vmatprep.subr.bf16.mxu1 %v1473_v0 }
  0xb9   : > { %1118 = vmatprep.subr.bf16.mxu0 %v1473_v0 }
  0xbb   : > { %1141 = vmatpush3.bf16.msra.mxu1 %v1140_v46 }
  0xbc   : > { %1120 = vmatpush3.bf16.msra.mxu0 %v1119_v45  ;;  %1142 = vmatprep.subr.bf16.mxu1 %v1473_v0 }
  0xbd   : > { %1145 = vmatprep.subr.bf16.mxu0 %v1473_v0 }
  0xbf   : > { %1025 = vmatmul.mubr.f32.vlgmr.msra.gmra.mrb[0].mxu0 %v450_v47  ;;  %1144 = vmatpush3.bf16.msra.mxu1 %v1143_v50 }
  0xc0   : > { %1094 = vmatprep.mubr.msk.f32.mxu0 %vm1474_vm0, %v1475_v1  ;;  %1147 = vmatpush3.bf16.msra.mxu0 %v1146_v54  ;;  %v648_v1 = vld [vmem:[%s1773_s20 + $0x48] sm:$0xff]  ;;  %s1379_s20 = sshll.u32 %s1476_s27, 4  ;;  %s1380_s20 = int_to_ptr.vmem [resolvable:$false] %s1379_s20 }
  0xc1   : > { %1148 = vmatprep.subr.bf16.mxu0 %v1473_v0  ;;  %v1158_v2 = vpack.c.bf16 %v648_v1, %v647_v63  ;;  %s1381_s19 = scalar_lea.vmem %s1380_s20, 256  ;;  %p1382_p10 = scmp.lt.s32.totalorder %s1875_s18, %s1380_s20 }
  0xc2   : > { %p1383_p7 = scmp.lt.s32.totalorder %s1381_s19, %s1375_s13 }
  0xc4   : > { %1150 = vmatpush3.bf16.msra.mxu0 %v1149_v56  ;;  %p1384_p3 = por %p1383_p7, %p1382_p10 }
  0xc5   : > { %1151 = vmatprep.subr.bf16.mxu0 %v1473_v0 }
  0xc6   : > { %p1385_p6 = pnand %p1384_p3, %p1378_p5 }
  0xc8   : > { %1153 = vmatpush3.bf16.msra.mxu0 %v1152_v59 }
  0xc9   : > { %1154 = vmatprep.subr.bf16.mxu0 %v1473_v0 }
  0xcc   : > { %1156 = vmatpush3.bf16.msra.mxu0 %v1155_v62 }
  0xcd   : > { %1157 = vmatprep.subr.bf16.mxu0 %v1473_v0 }
  0xd0   : > { %1159 = vmatpush3.bf16.msra.mxu0 %v1158_v2 }
  0xd1   : > { %1160 = vmatprep.subr.bf16.mxu0 %v1473_v0 }
  0xd4   : > { %1162 = vmatpush3.bf16.msra.mxu0 %v1161_v5 }
  0xd5   : > { %1163 = vmatprep.subr.bf16.mxu0 %v1473_v0 }
  0xd8   : > { %1165 = vmatpush3.bf16.msra.mxu0 %v1164_v8 }
  0xd9   : > { %1166 = vmatprep.subr.bf16.mxu0 %v1473_v0  ;;  %v932_v0 = vld [vmem:[%s446_s12] ss:$0 sm:$0xff] }
  0xdc   : > { %1168 = vmatpush3.bf16.msra.mxu0 %v1167_v16 }
 0x192   : > { %v540_v10 = vpop.f32.mrb[0].mxu0 }
 0x193   : > { %v541_v11 = vadd.f32 %v931_v9, %v540_v10  ;;  %v1026_v12 = vpop.f32.mrb[1].mxu0 }
 0x195   : > { %v544_v13 = vmax.f32 %v541_v11, 0.0 }
 0x197   : > { %1060 = vmatmul.mubr.f32.vlgmr.msra.gmra.mrb[0].mxu1 %v544_v13 }
 0x26a   : > { %v634_v17 = vpop.f32.mrb[0].mxu1 }
 0x26b   : > { %v635_v18 = vadd.f32 %v932_v0, %v634_v17  ;;  %v1061_v19 = vpop.f32.mrb[1].mxu1 }
 0x26d   : > { %v638_v20 = vmax.f32 %v635_v18, 0.0 }
 0x26f   : > { %1095 = vmatmul.mubr.f32.vlgmr.msra.gmra.mrb[2].mxu0 %v638_v20 }
 0x342   : > { %v728_v22 = vpop.f32.mrb[2].mxu0 }
 0x343   : > { %v729_v23 = vadd.f32 %v933_v21, %v728_v22  ;;  %v1096_v24 = vpop.f32.mrb[3].mxu0 }
 0x345   : > { %732 = vst [vmem:[%s440_s11] sm:$0xff] %v729_v23 }
 0x346   : > { %1388 = shalt.err (!%p1385_p6)
}
 0x347   : > { %s1389_s23 = scalar_lea.hbm %s1873_s10, 128  ;;  %s1393_s28 = scalar_lea.hbm %s1929_s7, 256 }
 0x348   : > { %p1390_p4 = scmp.ne.s32.totalorder %s1873_s10, %s1389_s23  ;;  %p1394_p12 = scmp.lt.u32.totalorder %s1873_s10, %s1929_s7 }
 0x349   : > { %p1395_p1 = scmp.lt.u32.totalorder %s1393_s28, %s1389_s23  ;;  %p1397_p13 = scmp.lt.u32.totalorder %s1389_s23, %s1873_s10 }
 0x34a   : > { %p1391_p9 = pnand %p1390_p4, %p1978_p11 }
 0x34b   : > { %p1396_p2 = por %p1395_p1, %p1394_p12 }
 0x34c   : > { %p1392_p8 = pneg %p1391_p9 }
 0x34d   : > { %p1398_p0 = por %p1397_p13, %p1396_p2 }
 0x34f   : > { %p1399_p5 = pnand %p1398_p0, %p1392_p8 }
 0x351   : > { %1402 = shalt.err (!%p1399_p5)
}
 0x352   : > { %1179 = dma.vmem_to_hbm [thread:$0]  (%p1978_p11), %s1875_s18, 128, %s1873_s10, %s734_s9  }
 0x353 PF: > { %s1979_s12 = sld [smem:[#allocation15_spill]]  ;;  %s1980_s3 = sld [smem:[#allocation20_spill]] }
 0x354   : > { %s1981_s24 = sld [smem:[#allocation17_spill]] }
 0x359   : > { %s760_s14 = sand.u32 1, %s1979_s12   ;;  %p1982_p10 = scmp.ne.s32.totalorder %s1980_s3, 0 }
 0x35a   : > { %p1983_p7 = scmp.ge.s32.totalorder %s1981_s24, 2  ;;  %s761_s21 = scalar_lea.sflag [#allocation4], %s760_s14 }
 0x35c   : > { %p1196_p3 = pnand %p1983_p7, %p1982_p10 }
 0x35e   : > { %1440 = dma.done.wait (!%p1196_p3), %s761_s21, 128  }
 0x35f   : > { %1442 = vsyncadd (!%p1196_p3), %s761_s21, 4294967168  ;;  %s27_s29 = sadd.s32 1, %s1981_s24   ;;  %s1984_s17 = sld [smem:[#allocation19_spill]] }
 0x360   : > { %p24_p6 = scmp.ge.s32.totalorder %s27_s29, 4   ;;  %s1985_s27 = sld [smem:[#allocation16_spill]] }
 0x361   : > { %s1986_s28 = sld [smem:[#allocation18_spill]]  ;;  %s1987_s24 = smov %s1449_s25 }
 0x362   : > { %s1988_s25 = smov %s1453_s26  ;;  %26 = sbr.rel (!%p24_p6) target bundleno = 12 (0xc), region = 132 }
 0x365   : > { %s1989_s26 = smov %s1984_s17 }
 0x369   :  { %766 = vsyncpa [#allocation3], 1 }
 0x36a   :  { %768 = vsyncpa [#allocation3 + $0x1], 1 }
 0x36b   :  { %769 = vsyncpa [#allocation6], 1 }
 0x36c   :  { %771 = vsyncpa [#allocation6 + $0x1], 1 }
 0x36d   :  { %772 = vsyncpa [#allocation9], 1 }
 0x36e   :  { %774 = vsyncpa [#allocation9 + $0x1], 1 }
 0x36f   :  { %775 = vsyncpa [#allocation4], 1 }
 0x370   :  { %777 = vsyncpa [#allocation4 + $0x1], 1 }

</bundles_post_ra>
